<compile_context>
chip_gen: v7x
topology: tpu7x:2x2x1
jax: 0.10.0
libtpu: 0.0.40
codegen_flags: <defaults>
</compile_context>

<pallas_src>
import functools

import numpy as np
import jax
import jax.numpy as jnp
from jax.experimental import pallas as pl
from jax.experimental.pallas import tpu as pltpu


# ----------------------------------------------------------------------------
# Fused Pallas kernel: whole N-BEATS network in one VMEM-resident pass
# ----------------------------------------------------------------------------
def _nbeats_fused_kernel(metas, context_length, prediction_length, *refs):
    """Fused N-BEATS forward.

    refs = [past_target, *fused_block_params..., state_out]

    `metas` is a static tuple of (kind, n_fc) per block with kind in
    {'G', 'B'} ('B' = shared-theta basis block, i.e. seasonal/trend).

    Fused per-block parameter layout (see `prepare_fused_params`):
      'G': (W, b) * n_fc, th_W (units, 2*td), proj_W (2*td, ctx+pred) block-
           diagonal with backcast columns negated, proj_b (1, ctx+pred).
      'B': (W, b) * n_fc, th_W (units, td), S (td, ctx+pred) with the
           backcast columns negated.

    The running state is a (batch, ctx+pred) slab: columns [:ctx] hold the
    current residual backcast, columns [ctx:] the accumulated forecast.
    Because the backcast columns of every projection were negated at build
    time, the residual update is simply `state += slab`.
    """
    x_ref = refs[0]
    out_ref = refs[-1]
    prefs = refs[1:-1]
    batch = x_ref.shape[0]

    x = x_ref[...]
    state = jnp.concatenate(
        [x, jnp.zeros((batch, prediction_length), jnp.float32)], axis=-1)

    idx = 0
    for kind, n_fc in metas:
        h = state[:, :context_length]          # current residual backcast
        for _ in range(n_fc):
            W = prefs[idx][...]
            b = prefs[idx + 1][...]
            idx += 2
            h = jnp.maximum(
                jnp.dot(h, W, preferred_element_type=jnp.float32) + b, 0.0)

        if kind == 'G':
            th_W = prefs[idx][...]      # (units, 2*td)   [theta_b | theta_f]
            proj_W = prefs[idx + 1][...]  # (2*td, ctx+pred) block-diag, bc cols negated
            proj_b = prefs[idx + 2][...]  # (1, ctx+pred)    [-bc_b | fc_b]
            idx += 3
            theta = jnp.maximum(
                jnp.dot(h, th_W, preferred_element_type=jnp.float32), 0.0)
            slab = (jnp.dot(theta, proj_W, preferred_element_type=jnp.float32)
                    + proj_b)
        else:  # shared-theta basis block (seasonal / trend)
            th_W = prefs[idx][...]      # (units, td)
            S = prefs[idx + 1][...]     # (td, ctx+pred)   [-S_backcast | S_forecast]
            idx += 2
            theta = jnp.dot(h, th_W, preferred_element_type=jnp.float32)
            slab = jnp.dot(theta, S, preferred_element_type=jnp.float32)

        # backcast -= block_backcast ; forecast += block_forecast
        state = state + slab

    out_ref[...] = state


# ----------------------------------------------------------------------------
# Parameter construction (deterministic, in-script)
# ----------------------------------------------------------------------------
def _linspace(backcast_length, forecast_length):
    lin_space = np.linspace(-backcast_length, forecast_length,
                            backcast_length + forecast_length,
                            dtype=np.float32)
    return lin_space[:backcast_length], lin_space[backcast_length:]


def _linear(key, din, dout, bias=True):
    kw, kb = jax.random.split(key)
    W = (jax.random.normal(kw, (din, dout), jnp.float32)
         * (1.0 / np.sqrt(din)))
    if not bias:
        return W, None
    b = jax.random.normal(kb, (1, dout), jnp.float32) * 0.01
    return W, b


def make_block(key, stack_type, units, thetas_dim, num_block_layers,
               context_length, prediction_length):
    """Builds a block with the ORIGINAL (un-fused) parameter layout."""
    keys = jax.random.split(key, num_block_layers + 6)
    ki = iter(keys)

    fc_params = []
    dims = [(context_length, units)] + [(units, units)] * (num_block_layers - 1)
    for din, dout in dims:
        W, b = _linear(next(ki), din, dout)
        fc_params += [W, b]

    if stack_type == 'G':
        thb_W, _ = _linear(next(ki), units, thetas_dim, bias=False)
        thf_W, _ = _linear(next(ki), units, thetas_dim, bias=False)
        bc_W, bc_b = _linear(next(ki), thetas_dim, context_length)
        fc_W, fc_b = _linear(next(ki), thetas_dim, prediction_length)
        params = fc_params + [thb_W, thf_W, bc_W, bc_b, fc_W, fc_b]
        return dict(kind='G', n_fc=num_block_layers, params=params)

    b_ls, f_ls = _linspace(context_length, prediction_length)
    if stack_type == 'S':
        thetas_dim = prediction_length  # nb_harmonics=None path
        p1 = thetas_dim // 2
        p2 = thetas_dim // 2 if thetas_dim % 2 == 0 else thetas_dim // 2 + 1
        S_backcast = np.concatenate(
            [np.stack([np.cos(2 * np.pi * i * b_ls) for i in range(p1)]),
             np.stack([np.sin(2 * np.pi * i * b_ls) for i in range(p2)])],
            axis=0).astype(np.float32)
        S_forecast = np.concatenate(
            [np.stack([np.cos(2 * np.pi * i * f_ls) for i in range(p1)]),
             np.stack([np.sin(2 * np.pi * i * f_ls) for i in range(p2)])],
            axis=0).astype(np.float32)
        basis_b, basis_f = jnp.asarray(S_backcast), jnp.asarray(S_forecast)
    else:  # 'T' trend block
        # TODO(synk): unnormalized linspace (as in the reference model) makes
        # b_ls**i grow as ctx**i; fine for small thetas_dim, loses f32
        # precision for larger ones.
        T_backcast = np.stack([b_ls ** i for i in range(thetas_dim)]
                              ).astype(np.float32)
        T_forecast = np.stack([f_ls ** i for i in range(thetas_dim)]
                              ).astype(np.float32)
        basis_b, basis_f = jnp.asarray(T_backcast), jnp.asarray(T_forecast)

    th_W, _ = _linear(next(ki), units, thetas_dim, bias=False)
    params = fc_params + [th_W, basis_b, basis_f]
    return dict(kind=stack_type, n_fc=num_block_layers, params=params)


def build_nbeats(key, prediction_length, context_length, num_stacks, widths,
                 num_blocks, num_block_layers, expansion_coefficient_lengths,
                 stack_types):
    blocks = []
    keys = jax.random.split(key, sum(num_blocks))
    k = 0
    for stack_id in range(num_stacks):
        for _ in range(num_blocks[stack_id]):
            blocks.append(
                make_block(keys[k], stack_types[stack_id], widths[stack_id],
                           expansion_coefficient_lengths[stack_id],
                           num_block_layers[stack_id],
                           context_length, prediction_length))
            k += 1
    return blocks


# ----------------------------------------------------------------------------
# Fused-parameter preparation (weight concatenation + sign folding, one-time)
# ----------------------------------------------------------------------------
def prepare_fused_params(blocks, context_length, prediction_length):
    """Collapse paired weights into single wide matrices (done on host, once).

    Returns (metas, flat_params) for `_nbeats_fused_kernel`.
    """
    metas = []
    params = []
    total = context_length + prediction_length
    for blk in blocks:
        p = blk['params']
        n_fc = blk['n_fc']
        params += list(p[:2 * n_fc])                 # (W, b) * n_fc unchanged

        if blk['kind'] == 'G':
            thb_W, thf_W, bc_W, bc_b, fc_W, fc_b = p[2 * n_fc:]
            td = thb_W.shape[1]
            th_W = jnp.concatenate([thb_W, thf_W], axis=1)        # (units, 2td)
            proj_W = jnp.zeros((2 * td, total), jnp.float32)
            proj_W = proj_W.at[:td, :context_length].set(-bc_W)   # sign-folded
            proj_W = proj_W.at[td:, context_length:].set(fc_W)
            proj_b = jnp.concatenate([-bc_b, fc_b], axis=1)       # (1, total)
            params += [th_W, proj_W, proj_b]
            metas.append(('G', n_fc))
        else:  # seasonal / trend: shared theta, fixed basis, no bias
            th_W, S_b, S_f = p[2 * n_fc:]
            S = jnp.concatenate([-S_b, S_f], axis=1)              # (td, total)
            params += [th_W, S]
            metas.append(('B', n_fc))
    return tuple(metas), params


# ----------------------------------------------------------------------------
# Network forward: one fused pallas_call for the whole network
# ----------------------------------------------------------------------------
def nbeats_forward(past_target, blocks, context_length, prediction_length):
    batch = past_target.shape[0]
    metas, params = prepare_fused_params(blocks, context_length,
                                         prediction_length)
    kernel = functools.partial(_nbeats_fused_kernel, metas,
                               context_length, prediction_length)
    vmem = pl.BlockSpec(memory_space=pltpu.MemorySpace.VMEM)
    # Gridless call: batch=4, ctx+pred=24 -> everything fits in a few vregs.
    # (At larger batch, add a grid over batch with dimension_semantics=
    #  ("parallel",) to use both v7x TensorCores and size tiles against the
    #  64 MiB v7x / 16 MiB v5e-scoped VMEM budgets.)
    state = pl.pallas_call(
        kernel,
        out_shape=jax.ShapeDtypeStruct(
            (batch, context_length + prediction_length), jnp.float32),
        in_specs=[vmem] * (1 + len(params)),
        out_specs=vmem,
    )(past_target, *params)
    return state[:, context_length:]


# ----------------------------------------------------------------------------
# Pure-JAX reference (for verification; original un-fused parameter layout)
# ----------------------------------------------------------------------------
def _ref_block(block, x):
    params = block['params']
    idx = 0
    h = x
    for _ in range(block['n_fc']):
        W, b = params[idx], params[idx + 1]
        idx += 2
        h = jnp.maximum(h @ W + b, 0.0)
    if block['kind'] == 'G':
        thb, thf, bcW, bcb, fcW, fcb = params[idx:idx + 6]
        tb = jnp.maximum(h @ thb, 0.0)
        tf = jnp.maximum(h @ thf, 0.0)
        return tb @ bcW + bcb, tf @ fcW + fcb
    thW, Sb, Sf = params[idx:idx + 3]
    th = h @ thW
    return th @ Sb, th @ Sf


def _ref_forward(past_target, blocks):
    if len(blocks) == 1:
        return _ref_block(blocks[0], past_target)[1]
    b0, forecast = _ref_block(blocks[0], past_target)
    backcast = past_target - b0
    for i in range(1, len(blocks) - 1):
        b, f = _ref_block(blocks[i], backcast)
        backcast = backcast - b
        forecast = forecast + f
    return forecast + _ref_block(blocks[-1], backcast)[1]


# ----------------------------------------------------------------------------
if __name__ == "__main__":
    key = jax.random.PRNGKey(0)
    k_params, k_input = jax.random.split(key)

    prediction_length = 8
    context_length = 16
    num_stacks = 3
    widths = [32, 32, 32]
    num_blocks = [1, 2, 1]
    num_block_layers = [2, 2, 2]
    expansion_coefficient_lengths = [3, 8, 4]   # S-stack entry is unused
    stack_types = ['T', 'S', 'G']
    batch = 4

    blocks = build_nbeats(k_params, prediction_length, context_length,
                          num_stacks, widths, num_blocks, num_block_layers,
                          expansion_coefficient_lengths, stack_types)

    past_target = jax.random.normal(k_input, (batch, context_length),
                                    jnp.float32)

    forecast = nbeats_forward(past_target, blocks, context_length,
                              prediction_length)
    forecast = jax.block_until_ready(forecast)

    ref = jax.block_until_ready(_ref_forward(past_target, blocks))
    assert forecast.shape == (batch, prediction_length)
    np.testing.assert_allclose(np.asarray(forecast), np.asarray(ref),
                               rtol=1e-4, atol=1e-4)
    print("KERNEL_OK")
</pallas_src>

<mosaic_0001>
module attributes {stable_mosaic.version = 11 : i64} {
  func.func @_nbeats_fused_kernel(%arg0: memref<4x16xf32, #tpu.memory_space<vmem>>, %arg1: memref<16x32xf32, #tpu.memory_space<vmem>>, %arg2: memref<1x32xf32, #tpu.memory_space<vmem>>, %arg3: memref<32x32xf32, #tpu.memory_space<vmem>>, %arg4: memref<1x32xf32, #tpu.memory_space<vmem>>, %arg5: memref<32x3xf32, #tpu.memory_space<vmem>>, %arg6: memref<3x24xf32, #tpu.memory_space<vmem>>, %arg7: memref<16x32xf32, #tpu.memory_space<vmem>>, %arg8: memref<1x32xf32, #tpu.memory_space<vmem>>, %arg9: memref<32x32xf32, #tpu.memory_space<vmem>>, %arg10: memref<1x32xf32, #tpu.memory_space<vmem>>, %arg11: memref<32x8xf32, #tpu.memory_space<vmem>>, %arg12: memref<8x24xf32, #tpu.memory_space<vmem>>, %arg13: memref<16x32xf32, #tpu.memory_space<vmem>>, %arg14: memref<1x32xf32, #tpu.memory_space<vmem>>, %arg15: memref<32x32xf32, #tpu.memory_space<vmem>>, %arg16: memref<1x32xf32, #tpu.memory_space<vmem>>, %arg17: memref<32x8xf32, #tpu.memory_space<vmem>>, %arg18: memref<8x24xf32, #tpu.memory_space<vmem>>, %arg19: memref<16x32xf32, #tpu.memory_space<vmem>>, %arg20: memref<1x32xf32, #tpu.memory_space<vmem>>, %arg21: memref<32x32xf32, #tpu.memory_space<vmem>>, %arg22: memref<1x32xf32, #tpu.memory_space<vmem>>, %arg23: memref<32x8xf32, #tpu.memory_space<vmem>>, %arg24: memref<8x24xf32, #tpu.memory_space<vmem>>, %arg25: memref<1x24xf32, #tpu.memory_space<vmem>>, %arg26: memref<4x24xf32, #tpu.memory_space<vmem>>) attributes {dimension_semantics = [], scalar_prefetch = 0 : i64, scratch_operands = 0 : i64, tpu.core_type = #tpu.core_type<tc>} {
    %c0 = arith.constant 0 : index
    %c0_0 = arith.constant 0 : index
    %0 = vector.load %arg0[%c0, %c0_0] : memref<4x16xf32, #tpu.memory_space<vmem>>, vector<4x16xf32>
    %cst = arith.constant 0.000000e+00 : f32
    %1 = vector.broadcast %cst : f32 to vector<4x8xf32>
    %2 = tpu.concatenate %0, %1 in 1 : vector<4x16xf32>, vector<4x8xf32> -> vector<4x24xf32>
    %3 = vector.extract_strided_slice %2 {offsets = [0, 0], sizes = [4, 16], strides = [1, 1]} : vector<4x24xf32> to vector<4x16xf32>
    %c0_1 = arith.constant 0 : index
    %c0_2 = arith.constant 0 : index
    %4 = vector.load %arg1[%c0_1, %c0_2] : memref<16x32xf32, #tpu.memory_space<vmem>>, vector<16x32xf32>
    %c0_3 = arith.constant 0 : index
    %c0_4 = arith.constant 0 : index
    %5 = vector.load %arg2[%c0_3, %c0_4] : memref<1x32xf32, #tpu.memory_space<vmem>>, vector<1x32xf32>
    %cst_5 = arith.constant dense<0.000000e+00> : vector<4x32xf32>
    %6 = tpu.matmul %3, %4, %cst_5 {dimension_numbers = #tpu.dot_dimension_numbers<[1], [0], [0], [1], [0, 0, 1, 1], [], []>} : vector<4x16xf32>, vector<16x32xf32>, vector<4x32xf32> -> vector<4x32xf32>
    %7 = vector.broadcast %5 : vector<1x32xf32> to vector<4x32xf32>
    %8 = arith.addf %6, %7 : vector<4x32xf32>
    %cst_6 = arith.constant 0.000000e+00 : f32
    %9 = vector.broadcast %cst_6 : f32 to vector<4x32xf32>
    %10 = arith.maximumf %8, %9 : vector<4x32xf32>
    %c0_7 = arith.constant 0 : index
    %c0_8 = arith.constant 0 : index
    %11 = vector.load %arg3[%c0_7, %c0_8] : memref<32x32xf32, #tpu.memory_space<vmem>>, vector<32x32xf32>
    %c0_9 = arith.constant 0 : index
    %c0_10 = arith.constant 0 : index
    %12 = vector.load %arg4[%c0_9, %c0_10] : memref<1x32xf32, #tpu.memory_space<vmem>>, vector<1x32xf32>
    %cst_11 = arith.constant dense<0.000000e+00> : vector<4x32xf32>
    %13 = tpu.matmul %10, %11, %cst_11 {dimension_numbers = #tpu.dot_dimension_numbers<[1], [0], [0], [1], [0, 0, 1, 1], [], []>} : vector<4x32xf32>, vector<32x32xf32>, vector<4x32xf32> -> vector<4x32xf32>
    %14 = vector.broadcast %12 : vector<1x32xf32> to vector<4x32xf32>
    %15 = arith.addf %13, %14 : vector<4x32xf32>
    %cst_12 = arith.constant 0.000000e+00 : f32
    %16 = vector.broadcast %cst_12 : f32 to vector<4x32xf32>
    %17 = arith.maximumf %15, %16 : vector<4x32xf32>
    %c0_13 = arith.constant 0 : index
    %c0_14 = arith.constant 0 : index
    %18 = vector.load %arg5[%c0_13, %c0_14] : memref<32x3xf32, #tpu.memory_space<vmem>>, vector<32x3xf32>
    %c0_15 = arith.constant 0 : index
    %c0_16 = arith.constant 0 : index
    %19 = vector.load %arg6[%c0_15, %c0_16] : memref<3x24xf32, #tpu.memory_space<vmem>>, vector<3x24xf32>
    %cst_17 = arith.constant dense<0.000000e+00> : vector<4x3xf32>
    %20 = tpu.matmul %17, %18, %cst_17 {dimension_numbers = #tpu.dot_dimension_numbers<[1], [0], [0], [1], [0, 0, 1, 1], [], []>} : vector<4x32xf32>, vector<32x3xf32>, vector<4x3xf32> -> vector<4x3xf32>
    %cst_18 = arith.constant dense<0.000000e+00> : vector<4x24xf32>
    %21 = tpu.matmul %20, %19, %cst_18 {dimension_numbers = #tpu.dot_dimension_numbers<[1], [0], [0], [1], [0, 0, 1, 1], [], []>} : vector<4x3xf32>, vector<3x24xf32>, vector<4x24xf32> -> vector<4x24xf32>
    %22 = arith.addf %2, %21 : vector<4x24xf32>
    %23 = vector.extract_strided_slice %22 {offsets = [0, 0], sizes = [4, 16], strides = [1, 1]} : vector<4x24xf32> to vector<4x16xf32>
    %c0_19 = arith.constant 0 : index
    %c0_20 = arith.constant 0 : index
    %24 = vector.load %arg7[%c0_19, %c0_20] : memref<16x32xf32, #tpu.memory_space<vmem>>, vector<16x32xf32>
    %c0_21 = arith.constant 0 : index
    %c0_22 = arith.constant 0 : index
    %25 = vector.load %arg8[%c0_21, %c0_22] : memref<1x32xf32, #tpu.memory_space<vmem>>, vector<1x32xf32>
    %cst_23 = arith.constant dense<0.000000e+00> : vector<4x32xf32>
    %26 = tpu.matmul %23, %24, %cst_23 {dimension_numbers = #tpu.dot_dimension_numbers<[1], [0], [0], [1], [0, 0, 1, 1], [], []>} : vector<4x16xf32>, vector<16x32xf32>, vector<4x32xf32> -> vector<4x32xf32>
    %27 = vector.broadcast %25 : vector<1x32xf32> to vector<4x32xf32>
    %28 = arith.addf %26, %27 : vector<4x32xf32>
    %cst_24 = arith.constant 0.000000e+00 : f32
    %29 = vector.broadcast %cst_24 : f32 to vector<4x32xf32>
    %30 = arith.maximumf %28, %29 : vector<4x32xf32>
    %c0_25 = arith.constant 0 : index
    %c0_26 = arith.constant 0 : index
    %31 = vector.load %arg9[%c0_25, %c0_26] : memref<32x32xf32, #tpu.memory_space<vmem>>, vector<32x32xf32>
    %c0_27 = arith.constant 0 : index
    %c0_28 = arith.constant 0 : index
    %32 = vector.load %arg10[%c0_27, %c0_28] : memref<1x32xf32, #tpu.memory_space<vmem>>, vector<1x32xf32>
    %cst_29 = arith.constant dense<0.000000e+00> : vector<4x32xf32>
    %33 = tpu.matmul %30, %31, %cst_29 {dimension_numbers = #tpu.dot_dimension_numbers<[1], [0], [0], [1], [0, 0, 1, 1], [], []>} : vector<4x32xf32>, vector<32x32xf32>, vector<4x32xf32> -> vector<4x32xf32>
    %34 = vector.broadcast %32 : vector<1x32xf32> to vector<4x32xf32>
    %35 = arith.addf %33, %34 : vector<4x32xf32>
    %cst_30 = arith.constant 0.000000e+00 : f32
    %36 = vector.broadcast %cst_30 : f32 to vector<4x32xf32>
    %37 = arith.maximumf %35, %36 : vector<4x32xf32>
    %c0_31 = arith.constant 0 : index
    %c0_32 = arith.constant 0 : index
    %38 = vector.load %arg11[%c0_31, %c0_32] : memref<32x8xf32, #tpu.memory_space<vmem>>, vector<32x8xf32>
    %c0_33 = arith.constant 0 : index
    %c0_34 = arith.constant 0 : index
    %39 = vector.load %arg12[%c0_33, %c0_34] : memref<8x24xf32, #tpu.memory_space<vmem>>, vector<8x24xf32>
    %cst_35 = arith.constant dense<0.000000e+00> : vector<4x8xf32>
    %40 = tpu.matmul %37, %38, %cst_35 {dimension_numbers = #tpu.dot_dimension_numbers<[1], [0], [0], [1], [0, 0, 1, 1], [], []>} : vector<4x32xf32>, vector<32x8xf32>, vector<4x8xf32> -> vector<4x8xf32>
    %cst_36 = arith.constant dense<0.000000e+00> : vector<4x24xf32>
    %41 = tpu.matmul %40, %39, %cst_36 {dimension_numbers = #tpu.dot_dimension_numbers<[1], [0], [0], [1], [0, 0, 1, 1], [], []>} : vector<4x8xf32>, vector<8x24xf32>, vector<4x24xf32> -> vector<4x24xf32>
    %42 = arith.addf %22, %41 : vector<4x24xf32>
    %43 = vector.extract_strided_slice %42 {offsets = [0, 0], sizes = [4, 16], strides = [1, 1]} : vector<4x24xf32> to vector<4x16xf32>
    %c0_37 = arith.constant 0 : index
    %c0_38 = arith.constant 0 : index
    %44 = vector.load %arg13[%c0_37, %c0_38] : memref<16x32xf32, #tpu.memory_space<vmem>>, vector<16x32xf32>
    %c0_39 = arith.constant 0 : index
    %c0_40 = arith.constant 0 : index
    %45 = vector.load %arg14[%c0_39, %c0_40] : memref<1x32xf32, #tpu.memory_space<vmem>>, vector<1x32xf32>
    %cst_41 = arith.constant dense<0.000000e+00> : vector<4x32xf32>
    %46 = tpu.matmul %43, %44, %cst_41 {dimension_numbers = #tpu.dot_dimension_numbers<[1], [0], [0], [1], [0, 0, 1, 1], [], []>} : vector<4x16xf32>, vector<16x32xf32>, vector<4x32xf32> -> vector<4x32xf32>
    %47 = vector.broadcast %45 : vector<1x32xf32> to vector<4x32xf32>
    %48 = arith.addf %46, %47 : vector<4x32xf32>
    %cst_42 = arith.constant 0.000000e+00 : f32
    %49 = vector.broadcast %cst_42 : f32 to vector<4x32xf32>
    %50 = arith.maximumf %48, %49 : vector<4x32xf32>
    %c0_43 = arith.constant 0 : index
    %c0_44 = arith.constant 0 : index
    %51 = vector.load %arg15[%c0_43, %c0_44] : memref<32x32xf32, #tpu.memory_space<vmem>>, vector<32x32xf32>
    %c0_45 = arith.constant 0 : index
    %c0_46 = arith.constant 0 : index
    %52 = vector.load %arg16[%c0_45, %c0_46] : memref<1x32xf32, #tpu.memory_space<vmem>>, vector<1x32xf32>
    %cst_47 = arith.constant dense<0.000000e+00> : vector<4x32xf32>
    %53 = tpu.matmul %50, %51, %cst_47 {dimension_numbers = #tpu.dot_dimension_numbers<[1], [0], [0], [1], [0, 0, 1, 1], [], []>} : vector<4x32xf32>, vector<32x32xf32>, vector<4x32xf32> -> vector<4x32xf32>
    %54 = vector.broadcast %52 : vector<1x32xf32> to vector<4x32xf32>
    %55 = arith.addf %53, %54 : vector<4x32xf32>
    %cst_48 = arith.constant 0.000000e+00 : f32
    %56 = vector.broadcast %cst_48 : f32 to vector<4x32xf32>
    %57 = arith.maximumf %55, %56 : vector<4x32xf32>
    %c0_49 = arith.constant 0 : index
    %c0_50 = arith.constant 0 : index
    %58 = vector.load %arg17[%c0_49, %c0_50] : memref<32x8xf32, #tpu.memory_space<vmem>>, vector<32x8xf32>
    %c0_51 = arith.constant 0 : index
    %c0_52 = arith.constant 0 : index
    %59 = vector.load %arg18[%c0_51, %c0_52] : memref<8x24xf32, #tpu.memory_space<vmem>>, vector<8x24xf32>
    %cst_53 = arith.constant dense<0.000000e+00> : vector<4x8xf32>
    %60 = tpu.matmul %57, %58, %cst_53 {dimension_numbers = #tpu.dot_dimension_numbers<[1], [0], [0], [1], [0, 0, 1, 1], [], []>} : vector<4x32xf32>, vector<32x8xf32>, vector<4x8xf32> -> vector<4x8xf32>
    %cst_54 = arith.constant dense<0.000000e+00> : vector<4x24xf32>
    %61 = tpu.matmul %60, %59, %cst_54 {dimension_numbers = #tpu.dot_dimension_numbers<[1], [0], [0], [1], [0, 0, 1, 1], [], []>} : vector<4x8xf32>, vector<8x24xf32>, vector<4x24xf32> -> vector<4x24xf32>
    %62 = arith.addf %42, %61 : vector<4x24xf32>
    %63 = vector.extract_strided_slice %62 {offsets = [0, 0], sizes = [4, 16], strides = [1, 1]} : vector<4x24xf32> to vector<4x16xf32>
    %c0_55 = arith.constant 0 : index
    %c0_56 = arith.constant 0 : index
    %64 = vector.load %arg19[%c0_55, %c0_56] : memref<16x32xf32, #tpu.memory_space<vmem>>, vector<16x32xf32>
    %c0_57 = arith.constant 0 : index
    %c0_58 = arith.constant 0 : index
    %65 = vector.load %arg20[%c0_57, %c0_58] : memref<1x32xf32, #tpu.memory_space<vmem>>, vector<1x32xf32>
    %cst_59 = arith.constant dense<0.000000e+00> : vector<4x32xf32>
    %66 = tpu.matmul %63, %64, %cst_59 {dimension_numbers = #tpu.dot_dimension_numbers<[1], [0], [0], [1], [0, 0, 1, 1], [], []>} : vector<4x16xf32>, vector<16x32xf32>, vector<4x32xf32> -> vector<4x32xf32>
    %67 = vector.broadcast %65 : vector<1x32xf32> to vector<4x32xf32>
    %68 = arith.addf %66, %67 : vector<4x32xf32>
    %cst_60 = arith.constant 0.000000e+00 : f32
    %69 = vector.broadcast %cst_60 : f32 to vector<4x32xf32>
    %70 = arith.maximumf %68, %69 : vector<4x32xf32>
    %c0_61 = arith.constant 0 : index
    %c0_62 = arith.constant 0 : index
    %71 = vector.load %arg21[%c0_61, %c0_62] : memref<32x32xf32, #tpu.memory_space<vmem>>, vector<32x32xf32>
    %c0_63 = arith.constant 0 : index
    %c0_64 = arith.constant 0 : index
    %72 = vector.load %arg22[%c0_63, %c0_64] : memref<1x32xf32, #tpu.memory_space<vmem>>, vector<1x32xf32>
    %cst_65 = arith.constant dense<0.000000e+00> : vector<4x32xf32>
    %73 = tpu.matmul %70, %71, %cst_65 {dimension_numbers = #tpu.dot_dimension_numbers<[1], [0], [0], [1], [0, 0, 1, 1], [], []>} : vector<4x32xf32>, vector<32x32xf32>, vector<4x32xf32> -> vector<4x32xf32>
    %74 = vector.broadcast %72 : vector<1x32xf32> to vector<4x32xf32>
    %75 = arith.addf %73, %74 : vector<4x32xf32>
    %cst_66 = arith.constant 0.000000e+00 : f32
    %76 = vector.broadcast %cst_66 : f32 to vector<4x32xf32>
    %77 = arith.maximumf %75, %76 : vector<4x32xf32>
    %c0_67 = arith.constant 0 : index
    %c0_68 = arith.constant 0 : index
    %78 = vector.load %arg23[%c0_67, %c0_68] : memref<32x8xf32, #tpu.memory_space<vmem>>, vector<32x8xf32>
    %c0_69 = arith.constant 0 : index
    %c0_70 = arith.constant 0 : index
    %79 = vector.load %arg24[%c0_69, %c0_70] : memref<8x24xf32, #tpu.memory_space<vmem>>, vector<8x24xf32>
    %c0_71 = arith.constant 0 : index
    %c0_72 = arith.constant 0 : index
    %80 = vector.load %arg25[%c0_71, %c0_72] : memref<1x24xf32, #tpu.memory_space<vmem>>, vector<1x24xf32>
    %cst_73 = arith.constant dense<0.000000e+00> : vector<4x8xf32>
    %81 = tpu.matmul %77, %78, %cst_73 {dimension_numbers = #tpu.dot_dimension_numbers<[1], [0], [0], [1], [0, 0, 1, 1], [], []>} : vector<4x32xf32>, vector<32x8xf32>, vector<4x8xf32> -> vector<4x8xf32>
    %cst_74 = arith.constant 0.000000e+00 : f32
    %82 = vector.broadcast %cst_74 : f32 to vector<4x8xf32>
    %83 = arith.maximumf %81, %82 : vector<4x8xf32>
    %cst_75 = arith.constant dense<0.000000e+00> : vector<4x24xf32>
    %84 = tpu.matmul %83, %79, %cst_75 {dimension_numbers = #tpu.dot_dimension_numbers<[1], [0], [0], [1], [0, 0, 1, 1], [], []>} : vector<4x8xf32>, vector<8x24xf32>, vector<4x24xf32> -> vector<4x24xf32>
    %85 = vector.broadcast %80 : vector<1x24xf32> to vector<4x24xf32>
    %86 = arith.addf %84, %85 : vector<4x24xf32>
    %87 = arith.addf %62, %86 : vector<4x24xf32>
    %c0_76 = arith.constant 0 : index
    %c0_77 = arith.constant 0 : index
    %88 = vector.load %arg26[%c0_76, %c0_77] : memref<4x24xf32, #tpu.memory_space<vmem>>, vector<4x24xf32>
    tpu.vector_store %arg26[%c0_76, %c0_77], %87 {strides = array<i32>} : memref<4x24xf32, #tpu.memory_space<vmem>>, vector<4x24xf32>,
    return
  }
}

</mosaic_0001>

<bundles_post_ra>
// kernel: tpu_custom_call.1
= control target key start
LH: loop header
LB: loop body
LE: loop exit
PB: predicated region body
PF: predicated region fallthrough
CT: control target
= control target key end

     0   :  { %s2509_s0 = inlined_call_operand.hbm [shape: f32[4,16], index: 0, kind: input, shape index: {}]   ;;  %s2510_s1 = inlined_call_operand.vmem [shape: f32[16,32], index: 1, kind: input, shape index: {}]   ;;  %s2511_s2 = inlined_call_operand.hbm [shape: f32[1,32], index: 2, kind: input, shape index: {}]   ;;  %s2512_s3 = inlined_call_operand.vmem [shape: f32[32,32], index: 3, kind: input, shape index: {}]   ;;  %s2513_s4 = inlined_call_operand.hbm [shape: f32[1,32], index: 4, kind: input, shape index: {}]   ;;  %s2514_s5 = inlined_call_operand.vmem [shape: f32[32,3], index: 5, kind: input, shape index: {}]   ;;  %s2515_s6 = inlined_call_operand.hbm [shape: f32[3,24], index: 6, kind: input, shape index: {}]   ;;  %s2516_s7 = inlined_call_operand.vmem [shape: f32[16,32], index: 7, kind: input, shape index: {}]   ;;  %s2517_s8 = inlined_call_operand.hbm [shape: f32[1,32], index: 8, kind: input, shape index: {}]   ;;  %s2518_s9 = inlined_call_operand.vmem [shape: f32[32,32], index: 9, kind: input, shape index: {}]   ;;  %s2519_s10 = inlined_call_operand.hbm [shape: f32[1,32], index: 10, kind: input, shape index: {}]   ;;  %s2520_s11 = inlined_call_operand.vmem [shape: f32[32,8], index: 11, kind: input, shape index: {}]   ;;  %s2521_s12 = inlined_call_operand.hbm [shape: f32[8,24], index: 12, kind: input, shape index: {}]   ;;  %s2522_s13 = inlined_call_operand.vmem [shape: f32[16,32], index: 13, kind: input, shape index: {}]   ;;  %s2523_s14 = inlined_call_operand.hbm [shape: f32[1,32], index: 14, kind: input, shape index: {}]   ;;  %s2524_s15 = inlined_call_operand.vmem [shape: f32[32,32], index: 15, kind: input, shape index: {}]   ;;  %s2525_s16 = inlined_call_operand.hbm [shape: f32[1,32], index: 16, kind: input, shape index: {}]   ;;  %s2526_s17 = inlined_call_operand.vmem [shape: f32[32,8], index: 17, kind: input, shape index: {}]   ;;  %s2527_s18 = inlined_call_operand.vmem [shape: f32[8,24], index: 18, kind: input, shape index: {}]   ;;  %s2528_s19 = inlined_call_operand.vmem [shape: f32[16,32], index: 19, kind: input, shape index: {}]   ;;  %s2529_s20 = inlined_call_operand.vmem [shape: f32[1,32], index: 20, kind: input, shape index: {}]   ;;  %s2530_s21 = inlined_call_operand.vmem [shape: f32[32,32], index: 21, kind: input, shape index: {}]   ;;  %s2531_s22 = inlined_call_operand.vmem [shape: f32[1,32], index: 22, kind: input, shape index: {}]   ;;  %s2532_s23 = inlined_call_operand.vmem [shape: f32[32,8], index: 23, kind: input, shape index: {}]   ;;  %s2533_s24 = inlined_call_operand.vmem [shape: f32[8,24], index: 24, kind: input, shape index: {}]   ;;  %s2534_s25 = inlined_call_operand.vmem [shape: f32[1,24], index: 25, kind: input, shape index: {}]   ;;  %s2535_s26 = inlined_call_operand.hbm [shape: f32[4,24], index: 26, kind: output, shape index: {}]  }
   0x1   :  { %2548 = sst [smem:[#allocation24_spill]] %s2509_s0 }
   0x2   :  { %2549 = sst [smem:[#allocation25_spill]] %s2510_s1 }
   0x3   :  { %2550 = sst [smem:[#allocation26_spill]] %s2511_s2 }
   0x4   :  { %2551 = sst [smem:[#allocation27_spill]] %s2512_s3 }
   0x5   :  { %2552 = sst [smem:[#allocation28_spill]] %s2513_s4 }
   0x6   :  { %2553 = sst [smem:[#allocation29_spill]] %s2514_s5 }
   0x7   :  { %2554 = sst [smem:[#allocation30_spill]] %s2515_s6 }
   0x8   :  { %2555 = sst [smem:[#allocation31_spill]] %s2516_s7 }
   0x9   :  { %2556 = sst [smem:[#allocation32_spill]] %s2517_s8 }
   0xa   :  { %2557 = sst [smem:[#allocation33_spill]] %s2518_s9 }
   0xb   :  { %2558 = sst [smem:[#allocation34_spill]] %s2519_s10 }
   0xc   :  { %2559 = sst [smem:[#allocation35_spill]] %s2535_s26 }
   0xd   :  { %31 = vsyncpa [#allocation3], 0 }
   0xe   :  { %32 = vsyncpa [#allocation6], 0 }
   0xf   :  { %33 = vsyncpa [#allocation9], 0 }
  0x10   :  { %34 = vsyncpa [#allocation12], 0 }
  0x11   :  { %35 = vsyncpa [#allocation15], 0 }
  0x12   :  { %36 = vsyncpa [#allocation4], 0  ;;  %s2034_s27 = smov [#allocation5]   ;;  %s2035_s7 = smov [#allocation8]  }
  0x13   :  { %s55_s3 = sshll.u32 %s2034_s27, 4  ;;  %s79_s28 = sshll.u32 %s2035_s7, 4  ;;  %s56_s3 = int_to_ptr.vmem [resolvable:$true] %s55_s3  ;;  %s80_s28 = int_to_ptr.vmem [resolvable:$true] %s79_s28 }
  0x14   :  { %s2560_s29 = sld [smem:[#allocation26_spill]] }
  0x1a   :  { %s1802_s0 = scalar_lea.hbm %s2560_s29, 16 }
  0x1b   :  { %p1803_p0 = scmp.ne.s32.totalorder %s2560_s29, %s1802_s0  ;;  %p1806_p1 = scmp.lt.u32.totalorder %s1802_s0, %s2560_s29 }
  0x1d   :  { %p1808_p2 = pnand %p1806_p1, %p1803_p0 }
  0x1f   :  { %1811 = shalt.err (!%p1808_p2)
}
  0x20   :  { %s1812_s10 = scalar_lea.vmem %s56_s3, 16  ;;  %s1816_s6 = scalar_lea.vmem %s56_s3, 32 }
  0x21   :  { %p1813_p3 = scmp.ne.s32.totalorder %s56_s3, %s1812_s10  ;;  %p1817_p4 = scmp.lt.s32.totalorder %s56_s3, %s56_s3 }
  0x22   :  { %p1818_p5 = scmp.lt.s32.totalorder %s1816_s6, %s1812_s10 }
  0x24   :  { %p1819_p6 = por %p1818_p5, %p1817_p4 }
  0x26   :  { %p1820_p7 = pnand %p1819_p6, %p1813_p3 }
  0x28   :  { %1823 = shalt.err (!%p1820_p7)
}
  0x29   :  { %58 = dma.hbm_to_vmem [thread:$0]  %s2560_s29, 16, %s56_s3, [#allocation6]  }
  0x2a   :  { %s2561_s4 = sld [smem:[#allocation30_spill]] }
  0x30   :  { %s1824_s9 = scalar_lea.hbm %s2561_s4, 64 }
  0x31   :  { %p1825_p8 = scmp.ne.s32.totalorder %s2561_s4, %s1824_s9  ;;  %p1828_p9 = scmp.lt.u32.totalorder %s1824_s9, %s2561_s4 }
  0x33   :  { %p1830_p10 = pnand %p1828_p9, %p1825_p8 }
  0x35   :  { %1833 = shalt.err (!%p1830_p10)
}
  0x36   :  { %s1834_s10 = scalar_lea.vmem %s80_s28, 64  ;;  %p1839_p12 = scmp.lt.s32.totalorder %s80_s28, %s80_s28 }
  0x37   :  { %p1835_p11 = scmp.ne.s32.totalorder %s80_s28, %s1834_s10  ;;  %p1840_p13 = scmp.lt.s32.totalorder %s1834_s10, %s1834_s10 }
  0x39   :  { %p1841_p0 = por %p1840_p13, %p1839_p12 }
  0x3b   :  { %p1842_p1 = pnand %p1841_p0, %p1835_p11 }
  0x3d   :  { %1845 = shalt.err (!%p1842_p1)
}
  0x3e   :  { %82 = dma.hbm_to_vmem [thread:$0]  %s2561_s4, 64, %s80_s28, [#allocation9]  }
  0x3f   :  { %s2036_s6 = smov [#allocation11]   ;;  %s2037_s27 = smov [#allocation14]  }
  0x40   :  { %s103_s1 = sshll.u32 %s2036_s6, 4  ;;  %s127_s7 = sshll.u32 %s2037_s27, 4  ;;  %s104_s1 = int_to_ptr.vmem [resolvable:$true] %s103_s1  ;;  %s128_s7 = int_to_ptr.vmem [resolvable:$true] %s127_s7 }
  0x41   :  { %s2562_s30 = sld [smem:[#allocation34_spill]] }
  0x47   :  { %s1846_s0 = scalar_lea.hbm %s2562_s30, 16 }
  0x48   :  { %p1847_p2 = scmp.ne.s32.totalorder %s2562_s30, %s1846_s0  ;;  %p1850_p3 = scmp.lt.u32.totalorder %s1846_s0, %s2562_s30 }
  0x4a   :  { %p1852_p4 = pnand %p1850_p3, %p1847_p2 }
  0x4c   :  { %1855 = shalt.err (!%p1852_p4)
}
  0x4d   :  { %s1856_s28 = scalar_lea.vmem %s104_s1, 16  ;;  %s1860_s4 = scalar_lea.vmem %s104_s1, 32 }
  0x4e   :  { %p1857_p5 = scmp.ne.s32.totalorder %s104_s1, %s1856_s28  ;;  %p1861_p6 = scmp.lt.s32.totalorder %s104_s1, %s104_s1 }
  0x4f   :  { %p1862_p7 = scmp.lt.s32.totalorder %s1860_s4, %s1856_s28 }
  0x51   :  { %p1863_p8 = por %p1862_p7, %p1861_p6 }
  0x53   :  { %p1864_p9 = pnand %p1863_p8, %p1857_p5 }
  0x55   :  { %1867 = shalt.err (!%p1864_p9)
}
  0x56   :  { %106 = dma.hbm_to_vmem [thread:$0]  %s2562_s30, 16, %s104_s1, [#allocation12]  }
  0x57   :  { %s1868_s8 = scalar_lea.hbm %s2523_s14, 16 }
  0x58   :  { %p1869_p10 = scmp.ne.s32.totalorder %s2523_s14, %s1868_s8  ;;  %p1872_p11 = scmp.lt.u32.totalorder %s1868_s8, %s2523_s14 }
  0x5a   :  { %p1874_p12 = pnand %p1872_p11, %p1869_p10 }
  0x5c   :  { %1877 = shalt.err (!%p1874_p12)
}
  0x5d   :  { %s1878_s5 = scalar_lea.vmem %s128_s7, 16  ;;  %s1882_s10 = scalar_lea.vmem %s128_s7, 32 }
  0x5e   :  { %p1879_p13 = scmp.ne.s32.totalorder %s128_s7, %s1878_s5  ;;  %p1883_p0 = scmp.lt.s32.totalorder %s128_s7, %s128_s7 }
  0x5f   :  { %p1884_p1 = scmp.lt.s32.totalorder %s1882_s10, %s1878_s5 }
  0x61   :  { %p1885_p2 = por %p1884_p1, %p1883_p0 }
  0x63   :  { %p1886_p3 = pnand %p1885_p2, %p1879_p13 }
  0x65   :  { %1889 = shalt.err (!%p1886_p3)
}
  0x66   :  { %130 = dma.hbm_to_vmem [thread:$0]  %s2523_s14, 16, %s128_s7, [#allocation15]  }
  0x67   :  { %s2038_s28 = smov [#allocation2]   ;;  %s2039_s3 = smov [#allocation7]  }
  0x68   :  { %s43_s4 = sshll.u32 %s2038_s28, 4  ;;  %s67_s29 = sshll.u32 %s2039_s3, 4  ;;  %s44_s4 = int_to_ptr.vmem [resolvable:$true] %s43_s4  ;;  %s68_s29 = int_to_ptr.vmem [resolvable:$true] %s67_s29 }
  0x69   :  { %s2563_s8 = sld [smem:[#allocation24_spill]] }
  0x6f   :  { %s1890_s26 = scalar_lea.hbm %s2563_s8, 64 }
  0x70   :  { %p1891_p4 = scmp.ne.s32.totalorder %s2563_s8, %s1890_s26  ;;  %p1894_p5 = scmp.lt.u32.totalorder %s1890_s26, %s2563_s8 }
  0x72   :  { %p1896_p6 = pnand %p1894_p5, %p1891_p4 }
  0x74   :  { %1899 = shalt.err (!%p1896_p6)
}
  0x75   :  { %s1900_s14 = scalar_lea.vmem %s44_s4, 64  ;;  %p1905_p8 = scmp.lt.s32.totalorder %s44_s4, %s44_s4 }
  0x76   :  { %p1901_p7 = scmp.ne.s32.totalorder %s44_s4, %s1900_s14  ;;  %p1906_p9 = scmp.lt.s32.totalorder %s1900_s14, %s1900_s14 }
  0x78   :  { %p1907_p10 = por %p1906_p9, %p1905_p8 }
  0x7a   :  { %p1908_p11 = pnand %p1907_p10, %p1901_p7 }
  0x7c   :  { %1911 = shalt.err (!%p1908_p11)
}
  0x7d   :  { %46 = dma.hbm_to_vmem [thread:$0]  %s2563_s8, 64, %s44_s4, [#allocation3]  }
  0x7e   :  { %s2564_s28 = sld [smem:[#allocation28_spill]] }
  0x84   :  { %s1912_s3 = scalar_lea.hbm %s2564_s28, 16 }
  0x85   :  { %p1913_p12 = scmp.ne.s32.totalorder %s2564_s28, %s1912_s3  ;;  %p1916_p13 = scmp.lt.u32.totalorder %s1912_s3, %s2564_s28 }
  0x87   :  { %p1918_p0 = pnand %p1916_p13, %p1913_p12 }
  0x89   :  { %1921 = shalt.err (!%p1918_p0)
}
  0x8a   :  { %s1922_s0 = scalar_lea.vmem %s68_s29, 16  ;;  %s1926_s2 = scalar_lea.vmem %s68_s29, 32 }
  0x8b   :  { %p1923_p1 = scmp.ne.s32.totalorder %s68_s29, %s1922_s0  ;;  %p1927_p2 = scmp.lt.s32.totalorder %s68_s29, %s68_s29 }
  0x8c   :  { %p1928_p3 = scmp.lt.s32.totalorder %s1926_s2, %s1922_s0 }
  0x8e   :  { %p1929_p4 = por %p1928_p3, %p1927_p2 }
  0x90   :  { %p1930_p5 = pnand %p1929_p4, %p1923_p1 }
  0x92   :  { %1933 = shalt.err (!%p1930_p5)
}
  0x93   :  { %70 = dma.hbm_to_vmem [thread:$0]  %s2564_s28, 16, %s68_s29, [#allocation6]  }
  0x94   :  { %s2040_s5 = smov [#allocation10]   ;;  %s2041_s7 = smov [#allocation13]  }
  0x95   :  { %s91_s14 = sshll.u32 %s2040_s5, 4  ;;  %s115_s10 = sshll.u32 %s2041_s7, 4  ;;  %s92_s14 = int_to_ptr.vmem [resolvable:$true] %s91_s14  ;;  %s116_s10 = int_to_ptr.vmem [resolvable:$true] %s115_s10 }
  0x96   :  { %s2565_s3 = sld [smem:[#allocation32_spill]] }
  0x9c   :  { %s1934_s6 = scalar_lea.hbm %s2565_s3, 16 }
  0x9d   :  { %p1935_p6 = scmp.ne.s32.totalorder %s2565_s3, %s1934_s6  ;;  %p1938_p7 = scmp.lt.u32.totalorder %s1934_s6, %s2565_s3 }
  0x9f   :  { %p1940_p8 = pnand %p1938_p7, %p1935_p6 }
  0xa1   :  { %1943 = shalt.err (!%p1940_p8)
}
  0xa2   :  { %s1944_s29 = scalar_lea.vmem %s92_s14, 16  ;;  %s1948_s28 = scalar_lea.vmem %s92_s14, 32 }
  0xa3   :  { %p1945_p9 = scmp.ne.s32.totalorder %s92_s14, %s1944_s29  ;;  %p1949_p10 = scmp.lt.s32.totalorder %s92_s14, %s92_s14 }
  0xa4   :  { %p1950_p11 = scmp.lt.s32.totalorder %s1948_s28, %s1944_s29 }
  0xa6   :  { %p1951_p12 = por %p1950_p11, %p1949_p10 }
  0xa8   :  { %p1952_p13 = pnand %p1951_p12, %p1945_p9 }
  0xaa   :  { %1955 = shalt.err (!%p1952_p13)
}
  0xab   :  { %94 = dma.hbm_to_vmem [thread:$0]  %s2565_s3, 16, %s92_s14, [#allocation9]  }
  0xac   :  { %s1956_s7 = scalar_lea.hbm %s2521_s12, 128 }
  0xad   :  { %p1957_p0 = scmp.ne.s32.totalorder %s2521_s12, %s1956_s7  ;;  %p1960_p1 = scmp.lt.u32.totalorder %s1956_s7, %s2521_s12 }
  0xaf   :  { %p1962_p2 = pnand %p1960_p1, %p1957_p0 }
  0xb1   :  { %1965 = shalt.err (!%p1962_p2)
}
  0xb2   :  { %s1966_s26 = scalar_lea.vmem %s116_s10, 128  ;;  %p1971_p4 = scmp.lt.s32.totalorder %s116_s10, %s116_s10 }
  0xb3   :  { %p1967_p3 = scmp.ne.s32.totalorder %s116_s10, %s1966_s26  ;;  %p1972_p5 = scmp.lt.s32.totalorder %s1966_s26, %s1966_s26 }
  0xb5   :  { %p1973_p6 = por %p1972_p5, %p1971_p4 }
  0xb7   :  { %p1974_p7 = pnand %p1973_p6, %p1967_p3 }
  0xb9   :  { %1977 = shalt.err (!%p1974_p7)
}
  0xba   :  { %118 = dma.hbm_to_vmem [thread:$0]  %s2521_s12, 128, %s116_s10, [#allocation12]  }
  0xbb   :  { %s2042_s9 = smov [#allocation16]   ;;  %s1978_s2 = scalar_lea.hbm %s2525_s16, 16 }
  0xbc   :  { %s139_s0 = sshll.u32 %s2042_s9, 4  ;;  %p1979_p8 = scmp.ne.s32.totalorder %s2525_s16, %s1978_s2  ;;  %s140_s0 = int_to_ptr.vmem [resolvable:$true] %s139_s0 }
  0xbd   :  { %p1982_p9 = scmp.lt.u32.totalorder %s1978_s2, %s2525_s16 }
  0xbf   :  { %p1984_p10 = pnand %p1982_p9, %p1979_p8 }
  0xc1   :  { %1987 = shalt.err (!%p1984_p10)
}
  0xc2   :  { %s1988_s1 = scalar_lea.vmem %s140_s0, 16  ;;  %s1992_s12 = scalar_lea.vmem %s140_s0, 32 }
  0xc3   :  { %p1989_p11 = scmp.ne.s32.totalorder %s140_s0, %s1988_s1  ;;  %p1993_p12 = scmp.lt.s32.totalorder %s140_s0, %s140_s0 }
  0xc4   :  { %p1994_p13 = scmp.lt.s32.totalorder %s1992_s12, %s1988_s1 }
  0xc6   :  { %p1995_p0 = por %p1994_p13, %p1993_p12 }
  0xc8   :  { %p1996_p1 = pnand %p1995_p0, %p1989_p11 }
  0xca   :  { %1999 = shalt.err (!%p1996_p1)
}
  0xcb   :  { %142 = dma.hbm_to_vmem [thread:$0]  %s2525_s16, 16, %s140_s0, [#allocation15]  }
  0xcc   :  { %2022 = dma.done.wait [#allocation3], 64  }
  0xcd   :  { %2023 = vsyncadd [#allocation3], 4294967232 }
  0xce   :  { %2024 = dma.done.wait [#allocation6], 32  }
  0xcf   :  { %2025 = vsyncadd [#allocation6], 4294967264 }
  0xd0   :  { %2026 = dma.done.wait [#allocation9], 80  }
  0xd1   :  { %2027 = vsyncadd [#allocation9], 4294967216 }
  0xd2   :  { %2028 = dma.done.wait [#allocation12], 144  }
  0xd3   :  { %2029 = vsyncadd [#allocation12], 4294967152 }
  0xd4   :  { %2030 = dma.done.wait [#allocation15], 32  }
  0xd5   :  { %2031 = vsyncadd [#allocation15], 4294967264  ;;  %v2043_v0 = vmov 0.0|0.0   ;;  %vm2044_vm0 = vmmov 0   ;;  %v2045_v1 = vmov 0.0   ;;  %s2566_s27 = sld [smem:[#allocation25_spill]] }
  0xd6   :  { %1729 = vmatprep.subr.bf16.mxu0 %v2043_v0  ;;  %1597 = vmatprep.mubr.msk.f32.mxu0 %vm2044_vm0, %v2045_v1  ;;  %v188_v4 = vld [vmem:[#allocation2] sm:$0xf]  ;;  %vm189_vm1 = vcmask 130048   ;;  %s2567_s0 = sld [smem:[#allocation27_spill]]  ;;  %s2568_s12 = sld [smem:[#allocation29_spill]]  ;;  %vm285_vm2 = vcmask 261120  }
  0xd7   :  { %1732 = vmatprep.subr.bf16.mxu1 %v2043_v0  ;;  %1608 = vmatprep.mubr.msk.f32.mxu1 %vm2044_vm0, %v2045_v1  ;;  %v190_v9 = vsel %vm189_vm1, %v188_v4, 0.0  ;;  %v1507_v16 = vld [vmem:[#allocation5] ss:$0 sm:$0xff]  ;;  %v364_v24 = vld [vmem:[#allocation8] sm:$0x7]  ;;  %vm442_vm3 = vcmask 1042432  }
  0xd8   :  { %v1509_v25 = vld [vmem:[#allocation7] ss:$0 sm:$0xff]  ;;  %s2569_s9 = sld [smem:[#allocation31_spill]]  ;;  %vm438_vm4 = vcmask 23552   ;;  %s2570_s4 = sld [smem:[#allocation33_spill]]  ;;  %v686_v45 = vld [vmem:[%s2520_s11 + $0x8] sm:$0xff] }
  0xd9   :  { %v685_v44 = vld [vmem:[%s2520_s11] sm:$0xff]  ;;  %v1514_v47 = vld [vmem:[#allocation10] ss:$0 sm:$0xff]  ;;  %v687_v52 = vld [vmem:[%s2520_s11 + $0x10] sm:$0xff]  ;;  %vm763_vm5 = vcmask 64512   ;;  %vm1486_vm6 = vcmask 191488  }
  0xda   :  { %v1754_v46 = vpack.c.bf16 %v686_v45, %v685_v44  ;;  %v688_v53 = vld [vmem:[%s2520_s11 + $0x18] sm:$0xff]  ;;  %v689_v55 = vld [vmem:[#allocation13] sm:$0xff]  ;;  %v1516_v56 = vld [vmem:[#allocation11] ss:$0 sm:$0xff] }
  0xdb   :  { %v191_v2 = vld [vmem:[%s2566_s27] sm:$0xff]  ;;  %v192_v3 = vld [vmem:[%s2566_s27 + $0x8] sm:$0xff]  ;;  %v1757_v54 = vpack.c.bf16 %v688_v53, %v687_v52  ;;  %v1328_v52 = vld [vmem:[%s2532_s23 + $0x10] sm:$0xff] }
  0xdc   :  { %v1730_v5 = vpack.c.bf16 %v192_v3, %v191_v2  ;;  %v274_v6 = vld [vmem:[%s2567_s0] sm:$0xff]  ;;  %v275_v7 = vld [vmem:[%s2567_s0 + $0x8] sm:$0xff]  ;;  %v276_v10 = vld [vmem:[%s2567_s0 + $0x10] sm:$0xff] }
  0xdd   :  { %v1733_v8 = vpack.c.bf16 %v275_v7, %v274_v6  ;;  %v277_v11 = vld [vmem:[%s2567_s0 + $0x18] sm:$0xff]  ;;  %v360_v13 = vld [vmem:[%s2568_s12] sm:$0xff]  ;;  %v361_v14 = vld [vmem:[%s2568_s12 + $0x8] sm:$0xff] }
  0xde   :  { %1731 = vmatpush3.bf16.msra.mxu0 %v1730_v5  ;;  %v1736_v12 = vpack.c.bf16 %v277_v11, %v276_v10  ;;  %v1739_v15 = vpack.c.bf16 %v361_v14, %v360_v13  ;;  %v362_v21 = vld [vmem:[%s2568_s12 + $0x10] sm:$0xff]  ;;  %v363_v22 = vld [vmem:[%s2568_s12 + $0x18] sm:$0xff]  ;;  %v517_v30 = vld [vmem:[%s2569_s9] sm:$0xff] }
  0xdf   :  { %1734 = vmatpush3.bf16.msra.mxu1 %v1733_v8  ;;  %1738 = vmatprep.subr.bf16.mxu0 %v2043_v0  ;;  %v1742_v23 = vpack.c.bf16 %v363_v22, %v362_v21  ;;  %v518_v31 = vld [vmem:[%s2569_s9 + $0x8] sm:$0xff]  ;;  %v600_v35 = vld [vmem:[%s2570_s4] sm:$0xff]  ;;  %v602_v41 = vld [vmem:[%s2570_s4 + $0x10] sm:$0xff] }
  0xe0   :  { %1735 = vmatprep.subr.bf16.mxu1 %v2043_v0  ;;  %v1745_v32 = vpack.c.bf16 %v518_v31, %v517_v30  ;;  %v601_v36 = vld [vmem:[%s2570_s4 + $0x8] sm:$0xff]  ;;  %v603_v42 = vld [vmem:[%s2570_s4 + $0x18] sm:$0xff]  ;;  %v838_v61 = vld [vmem:[%s2522_s13] sm:$0xff] }
  0xe1   :  { %1598 = vmatmul.mubr.msk.f32.vlgmr.msra.gmra.mrb[0].mxu0 %vm189_vm1, %v190_v9  ;;  %v1748_v37 = vpack.c.bf16 %v601_v36, %v600_v35  ;;  %v1751_v43 = vpack.c.bf16 %v603_v42, %v602_v41  ;;  %v839_v62 = vld [vmem:[%s2522_s13 + $0x8] sm:$0xff]  ;;  %v921_v4 = vld [vmem:[%s2524_s15] sm:$0xff]  ;;  %v923_v10 = vld [vmem:[%s2524_s15 + $0x10] sm:$0xff] }
  0xe2   :  { %1619 = vmatprep.mubr.msk.f32.mxu0 %vm2044_vm0, %v2045_v1  ;;  %1740 = vmatpush3.bf16.msra.mxu0 %v1739_v15  ;;  %v1760_v63 = vpack.c.bf16 %v839_v62, %v838_v61  ;;  %v922_v5 = vld [vmem:[%s2524_s15 + $0x8] sm:$0xff]  ;;  %v924_v11 = vld [vmem:[%s2524_s15 + $0x18] sm:$0xff]  ;;  %v1006_v13 = vld [vmem:[%s2526_s17] sm:$0xff] }
  0xe3   :  { %1737 = vmatpush3.bf16.msra.mxu1 %v1736_v12  ;;  %1741 = vmatprep.subr.bf16.mxu0 %v2043_v0  ;;  %v1763_v6 = vpack.c.bf16 %v922_v5, %v921_v4  ;;  %v1766_v12 = vpack.c.bf16 %v924_v11, %v923_v10  ;;  %v1007_v14 = vld [vmem:[%s2526_s17 + $0x8] sm:$0xff]  ;;  %v1008_v21 = vld [vmem:[%s2526_s17 + $0x10] sm:$0xff]  ;;  %v1009_v22 = vld [vmem:[%s2526_s17 + $0x18] sm:$0xff] }
  0xe4   :  { %1622 = vmatprep.subr.mxu1 %v2045_v1  ;;  %v1769_v15 = vpack.c.bf16 %v1007_v14, %v1006_v13  ;;  %v1158_v30 = vld [vmem:[%s2528_s19] sm:$0xff]  ;;  %v1159_v31 = vld [vmem:[%s2528_s19 + $0x8] sm:$0xff]  ;;  %v1243_v41 = vld [vmem:[%s2530_s21 + $0x10] sm:$0xff] }
  0xe5   :  { %v1241_v35 = vld [vmem:[%s2530_s21] sm:$0xff]  ;;  %v1242_v36 = vld [vmem:[%s2530_s21 + $0x8] sm:$0xff]  ;;  %v1244_v42 = vld [vmem:[%s2530_s21 + $0x18] sm:$0xff] }
  0xe6   :  { %1743 = vmatpush3.bf16.msra.mxu0 %v1742_v23  ;;  %v1772_v23 = vpack.c.bf16 %v1009_v22, %v1008_v21  ;;  %v1326_v44 = vld [vmem:[%s2532_s23] sm:$0xff]  ;;  %v1327_v45 = vld [vmem:[%s2532_s23 + $0x8] sm:$0xff] }
  0xe7   :  { %1744 = vmatprep.subr.bf16.mxu0 %v2043_v0  ;;  %v1531_v62 = vld [vmem:[%s2534_s25] ss:$0 sm:$0xff] }
 0x1b4   :  { %v269_v17 = vpop.f32.mrb[0].mxu0 }
 0x1b5   :  { %v270_v18 = vadd.f32 %v1507_v16, %v269_v17  ;;  %v1599_v19 = vpop.f32.mrb[1].mxu0  ;;  %v1520_v16 = vld [vmem:[#allocation14] ss:$0 sm:$0xff] }
 0x1b7   :  { %v273_v20 = vmax.f32 %v270_v18, 0.0 }
 0x1b9   :  { %1609 = vmatmul.mubr.msk.f32.vlgmr.msra.gmra.mrb[0].mxu1 %vm285_vm2, %v273_v20 }
 0x1ba   :  { %1624 = vmatprep.mubr.msk.f32.mxu1 %vm2044_vm0, %v2045_v1  ;;  %1623 = vmatpush3.msk.msra.mxu1 %vm442_vm3, %v364_v24  ;;  %v1010_v24 = vld [vmem:[%s2527_s18] sm:$0xff] }
 0x1bb   :  { %1747 = vmatprep.subr.bf16.mxu1 %v2043_v0 }
 0x28c   :  { %v355_v26 = vpop.f32.mrb[0].mxu1 }
 0x28d   :  { %v356_v27 = vadd.f32 %v1509_v25, %v355_v26  ;;  %v1610_v28 = vpop.f32.mrb[1].mxu1  ;;  %v1522_v25 = vld [vmem:[#allocation16] ss:$0 sm:$0xff] }
 0x28f   :  { %v359_v29 = vmax.f32 %v356_v27, 0.0 }
 0x291   :  { %1620 = vmatmul.mubr.msk.f32.vlgmr.msra.gmra.mrb[2].mxu0 %vm285_vm2, %v359_v29 }
 0x292   :  { %1631 = vmatprep.mubr.msk.f32.mxu0 %vm2044_vm0, %v2045_v1  ;;  %1746 = vmatpush3.bf16.msra.mxu0 %v1745_v32  ;;  %v1775_v32 = vpack.c.bf16 %v1159_v31, %v1158_v30 }
 0x293   :  { %1753 = vmatprep.subr.bf16.mxu0 %v2043_v0 }
 0x364   :  { %v434_v33 = vpop.f32.mrb[2].mxu0 }
 0x365   :  { %v1621_v34 = vpop.f32.mrb[3].mxu0  ;;  %1625 = vmatmul.mubr.msk.f32.vlgmr.msra.gmra.mrb[2].mxu1 %vm438_vm4, %v434_v33 }
 0x366   :  { %1642 = vmatprep.mubr.msk.f32.mxu1 %vm2044_vm0, %v2045_v1  ;;  %1749 = vmatpush3.bf16.msra.mxu1 %v1748_v37  ;;  %v1778_v37 = vpack.c.bf16 %v1242_v36, %v1241_v35 }
 0x367   :  { %1750 = vmatprep.subr.bf16.mxu1 %v2043_v0 }
 0x36a   :  { %1752 = vmatpush3.bf16.msra.mxu1 %v1751_v43  ;;  %v1781_v43 = vpack.c.bf16 %v1244_v42, %v1243_v41 }
 0x36b   :  { %1656 = vmatprep.subr.mxu1 %v2045_v1 }
 0x438   :  { %v512_v38 = vpop.f32.mrb[2].mxu1 }
 0x439   :  { %v516_v39 = vadd.f32 %v512_v38, %v190_v9  ;;  %v1626_v40 = vpop.f32.mrb[3].mxu1 }
 0x43b   :  { %1632 = vmatmul.mubr.msk.f32.vlgmr.msra.gmra.mrb[4].mxu0 %vm189_vm1, %v516_v39 }
 0x43c   :  { %1653 = vmatprep.mubr.msk.f32.mxu0 %vm2044_vm0, %v2045_v1  ;;  %1755 = vmatpush3.bf16.msra.mxu0 %v1754_v46  ;;  %v1784_v46 = vpack.c.bf16 %v1327_v45, %v1326_v44 }
 0x43d   :  { %1756 = vmatprep.subr.bf16.mxu0 %v2043_v0 }
 0x440   :  { %1758 = vmatpush3.bf16.msra.mxu0 %v1757_v54  ;;  %v1330_v54 = vld [vmem:[%s2533_s24] sm:$0xff]  ;;  %s2046_s24 = smov [#allocation17]  }
 0x441   :  { %1759 = vmatprep.subr.bf16.mxu0 %v2043_v0  ;;  %s1494_s17 = sshll.u32 %s2046_s24, 4  ;;  %s1495_s17 = int_to_ptr.vmem [resolvable:$true] %s1494_s17 }
 0x442   :  { %p2005_p3 = scmp.lt.s32.totalorder %s1495_s17, %s1495_s17 }
 0x50e   :  { %v595_v48 = vpop.f32.mrb[4].mxu0 }
 0x50f   :  { %v596_v49 = vadd.f32 %v1514_v47, %v595_v48  ;;  %v1633_v50 = vpop.f32.mrb[5].mxu0  ;;  %v1526_v47 = vld [vmem:[%s2529_s20] ss:$0 sm:$0xff] }
 0x511   :  { %v599_v51 = vmax.f32 %v596_v49, 0.0 }
 0x513   :  { %1643 = vmatmul.mubr.msk.f32.vlgmr.msra.gmra.mrb[4].mxu1 %vm285_vm2, %v599_v51 }
 0x514   :  { %1658 = vmatprep.mubr.msk.f32.mxu1 %vm2044_vm0, %v2045_v1  ;;  %1657 = vmatpush3.msra.mxu1 %v689_v55  ;;  %v1528_v55 = vld [vmem:[%s2531_s22] ss:$0 sm:$0xff]  ;;  %s2000_s22 = scalar_lea.vmem %s1495_s17, 64 }
 0x515   :  { %1762 = vmatprep.subr.bf16.mxu1 %v2043_v0  ;;  %p2001_p2 = scmp.ne.s32.totalorder %s1495_s17, %s2000_s22  ;;  %p2006_p4 = scmp.lt.s32.totalorder %s2000_s22, %s2000_s22 }
 0x517   :  { %p2007_p5 = por %p2006_p4, %p2005_p3 }
 0x519   :  { %p2008_p6 = pnand %p2007_p5, %p2001_p2 }
 0x5e6   :  { %v680_v57 = vpop.f32.mrb[4].mxu1 }
 0x5e7   :  { %v681_v58 = vadd.f32 %v1516_v56, %v680_v57  ;;  %v1644_v59 = vpop.f32.mrb[5].mxu1 }
 0x5e9   :  { %v684_v60 = vmax.f32 %v681_v58, 0.0 }
 0x5eb   :  { %1654 = vmatmul.mubr.msk.f32.vlgmr.msra.gmra.mrb[6].mxu0 %vm285_vm2, %v684_v60 }
 0x5ec   :  { %1665 = vmatprep.mubr.msk.f32.mxu0 %vm2044_vm0, %v2045_v1  ;;  %1761 = vmatpush3.bf16.msra.mxu0 %v1760_v63 }
 0x5ed   :  { %1768 = vmatprep.subr.bf16.mxu0 %v2043_v0 }
 0x6be   :  { %v759_v2 = vpop.f32.mrb[6].mxu0 }
 0x6bf   :  { %v1655_v3 = vpop.f32.mrb[7].mxu0  ;;  %1659 = vmatmul.mubr.msk.f32.vlgmr.msra.gmra.mrb[6].mxu1 %vm763_vm5, %v759_v2 }
 0x6c0   :  { %1676 = vmatprep.mubr.msk.f32.mxu1 %vm2044_vm0, %v2045_v1  ;;  %1764 = vmatpush3.bf16.msra.mxu1 %v1763_v6 }
 0x6c1   :  { %1765 = vmatprep.subr.bf16.mxu1 %v2043_v0 }
 0x6c4   :  { %1767 = vmatpush3.bf16.msra.mxu1 %v1766_v12 }
 0x6c5   :  { %1690 = vmatprep.subr.mxu1 %v2045_v1 }
 0x792   :  { %v833_v7 = vpop.f32.mrb[6].mxu1 }
 0x793   :  { %v837_v8 = vadd.f32 %v833_v7, %v516_v39  ;;  %v1660_v9 = vpop.f32.mrb[7].mxu1 }
 0x795   :  { %1666 = vmatmul.mubr.msk.f32.vlgmr.msra.gmra.mrb[8].mxu0 %vm189_vm1, %v837_v8 }
 0x796   :  { %1687 = vmatprep.mubr.msk.f32.mxu0 %vm2044_vm0, %v2045_v1  ;;  %1770 = vmatpush3.bf16.msra.mxu0 %v1769_v15 }
 0x797   :  { %1771 = vmatprep.subr.bf16.mxu0 %v2043_v0 }
 0x79a   :  { %1773 = vmatpush3.bf16.msra.mxu0 %v1772_v23 }
 0x79b   :  { %1774 = vmatprep.subr.bf16.mxu0 %v2043_v0 }
 0x868   :  { %v916_v17 = vpop.f32.mrb[8].mxu0 }
 0x869   :  { %v917_v18 = vadd.f32 %v1520_v16, %v916_v17  ;;  %v1667_v19 = vpop.f32.mrb[9].mxu0 }
 0x86b   :  { %v920_v20 = vmax.f32 %v917_v18, 0.0 }
 0x86d   :  { %1677 = vmatmul.mubr.msk.f32.vlgmr.msra.gmra.mrb[8].mxu1 %vm285_vm2, %v920_v20 }
 0x86e   :  { %1692 = vmatprep.mubr.msk.f32.mxu1 %vm2044_vm0, %v2045_v1  ;;  %1691 = vmatpush3.msra.mxu1 %v1010_v24 }
 0x86f   :  { %1777 = vmatprep.subr.bf16.mxu1 %v2043_v0 }
 0x940   :  { %v1001_v26 = vpop.f32.mrb[8].mxu1 }
 0x941   :  { %v1002_v27 = vadd.f32 %v1522_v25, %v1001_v26  ;;  %v1678_v28 = vpop.f32.mrb[9].mxu1 }
 0x943   :  { %v1005_v29 = vmax.f32 %v1002_v27, 0.0 }
 0x945   :  { %1688 = vmatmul.mubr.msk.f32.vlgmr.msra.gmra.mrb[10].mxu0 %vm285_vm2, %v1005_v29 }
 0x946   :  { %1699 = vmatprep.mubr.msk.f32.mxu0 %vm2044_vm0, %v2045_v1  ;;  %1776 = vmatpush3.bf16.msra.mxu0 %v1775_v32 }
 0x947   :  { %1783 = vmatprep.subr.bf16.mxu0 %v2043_v0 }
 0xa18   :  { %v1080_v33 = vpop.f32.mrb[10].mxu0 }
 0xa19   :  { %v1689_v34 = vpop.f32.mrb[11].mxu0  ;;  %1693 = vmatmul.mubr.msk.f32.vlgmr.msra.gmra.mrb[10].mxu1 %vm763_vm5, %v1080_v33 }
 0xa1a   :  { %1710 = vmatprep.mubr.msk.f32.mxu1 %vm2044_vm0, %v2045_v1  ;;  %1779 = vmatpush3.bf16.msra.mxu1 %v1778_v37 }
 0xa1b   :  { %1780 = vmatprep.subr.bf16.mxu1 %v2043_v0 }
 0xa1e   :  { %1782 = vmatpush3.bf16.msra.mxu1 %v1781_v43 }
 0xa1f   :  { %1724 = vmatprep.subr.mxu1 %v2045_v1 }
 0xaec   :  { %v1153_v38 = vpop.f32.mrb[10].mxu1 }
 0xaed   :  { %v1157_v39 = vadd.f32 %v1153_v38, %v837_v8  ;;  %v1694_v40 = vpop.f32.mrb[11].mxu1 }
 0xaef   :  { %1700 = vmatmul.mubr.msk.f32.vlgmr.msra.gmra.mrb[12].mxu0 %vm189_vm1, %v1157_v39 }
 0xaf0   :  { %1721 = vmatprep.mubr.msk.f32.mxu0 %vm2044_vm0, %v2045_v1  ;;  %1785 = vmatpush3.bf16.msra.mxu0 %v1784_v46 }
 0xaf1   :  { %1786 = vmatprep.subr.bf16.mxu0 %v2043_v0  ;;  %v1329_v0 = vld [vmem:[%s2532_s23 + $0x18] sm:$0xff] }
 0xaf2   :  { %v1787_v53 = vpack.c.bf16 %v1329_v0, %v1328_v52 }
 0xaf4   :  { %1788 = vmatpush3.bf16.msra.mxu0 %v1787_v53 }
 0xbc2   :  { %v1236_v48 = vpop.f32.mrb[12].mxu0 }
 0xbc3   :  { %v1237_v49 = vadd.f32 %v1526_v47, %v1236_v48  ;;  %v1701_v50 = vpop.f32.mrb[13].mxu0 }
 0xbc5   :  { %v1240_v51 = vmax.f32 %v1237_v49, 0.0 }
 0xbc7   :  { %1711 = vmatmul.mubr.msk.f32.vlgmr.msra.gmra.mrb[12].mxu1 %vm285_vm2, %v1240_v51 }
 0xbc8   :  { %1726 = vmatprep.mubr.msk.f32.mxu1 %vm2044_vm0, %v2045_v1  ;;  %1725 = vmatpush3.msra.mxu1 %v1330_v54 }
 0xc9a   :  { %v1321_v1 = vpop.f32.mrb[12].mxu1 }
 0xc9b   :  { %v1322_v56 = vadd.f32 %v1528_v55, %v1321_v1  ;;  %v1712_v57 = vpop.f32.mrb[13].mxu1 }
 0xc9d   :  { %v1325_v58 = vmax.f32 %v1322_v56, 0.0 }
 0xc9f   :  { %1722 = vmatmul.mubr.msk.f32.vlgmr.msra.gmra.mrb[14].mxu0 %vm285_vm2, %v1325_v58 }
 0xd72   :  { %v1401_v59 = vpop.f32.mrb[14].mxu0 }
 0xd73   :  { %v1405_v60 = vmax.f32 %v1401_v59, 0.0  ;;  %v1723_v61 = vpop.f32.mrb[15].mxu0 }
 0xd75   :  { %1727 = vmatmul.mubr.msk.f32.vlgmr.msra.gmra.mrb[14].mxu1 %vm763_vm5, %v1405_v60 }
 0xe48   :  { %v1481_v63 = vpop.f32.mrb[14].mxu1 }
 0xe49   :  { %v1482_v2 = vadd.f32 %v1531_v62, %v1481_v63  ;;  %v1728_v3 = vpop.f32.mrb[15].mxu1 }
 0xe4b   :  { %v1485_v4 = vadd.f32 %v1482_v2, %v1157_v39 }
 0xe4d   :  { %1487 = vst.msk [vmem:[#allocation17] sm:$0xf] %vm1486_vm6, %v1485_v4 }
 0xe4e   :  { %2011 = shalt.err (!%p2008_p6)
}
 0xe4f   :  { %s2571_s29 = sld [smem:[#allocation35_spill]] }
 0xe55   :  { %s2012_s25 = scalar_lea.hbm %s2571_s29, 64 }
 0xe56   :  { %p2013_p7 = scmp.ne.s32.totalorder %s2571_s29, %s2012_s25  ;;  %p2016_p8 = scmp.lt.u32.totalorder %s2012_s25, %s2571_s29 }
 0xe58   :  { %p2018_p9 = pnand %p2016_p8, %p2013_p7 }
 0xe5a   :  { %2021 = shalt.err (!%p2018_p9)
}
 0xe5b   :  { %1497 = dma.vmem_to_hbm [thread:$0]  %s1495_s17, 64, %s2571_s29, [#allocation4]  }
 0xe5c   :  { %2032 = dma.done.wait [#allocation4], 64  }
 0xe5d   :  { %2033 = vsyncadd [#allocation4], 4294967232 }
 0xe5e   :  { %1501 = vsyncpa [#allocation3], 1 }
 0xe5f   :  { %1502 = vsyncpa [#allocation6], 1 }
 0xe60   :  { %1503 = vsyncpa [#allocation9], 1 }
 0xe61   :  { %1504 = vsyncpa [#allocation12], 1 }
 0xe62   :  { %1505 = vsyncpa [#allocation15], 1 }
 0xe63   :  { %1506 = vsyncpa [#allocation4], 1 }

</bundles_post_ra>
